<compile_context>
chip_gen: v7x
topology: tpu7x:2x2x1
jax: 0.10.0
libtpu: 0.0.40
codegen_flags: <defaults>
</compile_context>

<pallas_src>
import math
import jax
import jax.numpy as jnp
from jax.experimental import pallas as pl
from jax.experimental.pallas import tpu as pltpu

# ---- hyperparameters implied by the PyTorch script (small, synthetic) ----
LATENT_DIM = 8
IMG_SIZE = 16
CHANNELS = 1
IMG_SHAPE = (CHANNELS, IMG_SIZE, IMG_SIZE)
NC = int(math.sqrt(IMG_SIZE) // 1)  # neuron_complexity = sqrt(img_size) // 1 = 4
DIMS = [
    LATENT_DIM,                      # 8
    int(10 * NC),                    # 40
    int(6 * NC),                     # 24
    int(7 * NC),                     # 28
    int(3 * NC),                     # 12
    CHANNELS * IMG_SIZE * IMG_SIZE,  # 256
]
BN_EPS = 0.8
LEAKY_SLOPE = 0.2

# ---- packed-parameter layout (single slab, all tiles 128-aligned) ----
H = 128        # padded hidden width (all hidden dims <= 128)
OUT_F = 256    # final output features (= C*H*W), already 2x128 lanes
# weight tiles inside the slab:
#   rows   0:128, cols   0:128 -> W1 (8   x 40 )
#   rows   0:128, cols 128:256 -> W2 (40  x 24 )
#   rows 128:256, cols   0:128 -> W3 (24  x 28 )
#   rows 128:256, cols 128:256 -> W4 (28  x 12 )
#   rows 256:384, cols   0:256 -> W5 (12  x 256)
# vector rows (bias / gamma / beta), one per row, below the weights:
#   row 384: b1 | 385: b2 386: g2 387: be2 | 388: b3 389: g3 390: be3
#   391: b4 392: g4 393: be4 | 394: b5 | 395..399: zero pad
W_ROWS = 3 * H          # 384
V_ROW0 = W_ROWS         # 384
SLAB_ROWS = W_ROWS + 16  # 400


def _leaky_relu(x):
    return jnp.where(x > 0, x, LEAKY_SLOPE * x)


def generator_kernel(z_ref, p_ref, out_ref):
    """Whole Generator forward on one VMEM-resident block (shapes are tiny).

    z_ref : (B, 128)   latent, zero-padded in lanes LATENT_DIM:128
    p_ref : (400, 256) packed parameter slab (see layout above)
    out   : (B, 256)   flat image, lane-dense
    """
    z = z_ref[...]

    # static, tile-aligned views into the slab (zero-cost)
    w1 = p_ref[0:H, 0:H]
    w2 = p_ref[0:H, H:2 * H]
    w3 = p_ref[H:2 * H, 0:H]
    w4 = p_ref[H:2 * H, H:2 * H]
    w5 = p_ref[2 * H:3 * H, 0:OUT_F]

    def vrow(r, width):
        return p_ref[V_ROW0 + r:V_ROW0 + r + 1, 0:width]

    # block 1: Linear + LeakyReLU (normalize=False)
    h = jnp.dot(z, w1, preferred_element_type=jnp.float32) + vrow(0, H)
    h = _leaky_relu(h)

    def bn_block(h, w, r):
        y = jnp.dot(h, w, preferred_element_type=jnp.float32) + vrow(r, H)
        # training-mode BatchNorm1d: batch mean + biased batch variance, eps=0.8.
        # One-pass variance + affine folded into scale/shift. Padded lanes have
        # y == 0 and gamma == beta == 0 -> stay exactly 0 after the block.
        mean = jnp.mean(y, axis=0, keepdims=True)
        var = jnp.mean(y * y, axis=0, keepdims=True) - mean * mean
        scale = vrow(r + 1, H) * jax.lax.rsqrt(var + BN_EPS)   # gamma * rsqrt
        shift = vrow(r + 2, H) - mean * scale                  # beta - mean*scale
        return _leaky_relu(y * scale + shift)

    h = bn_block(h, w2, 1)
    h = bn_block(h, w3, 4)
    h = bn_block(h, w4, 7)

    # final Linear + Tanh (output stays lane-dense: last dim 256)
    out = jnp.dot(h, w5, preferred_element_type=jnp.float32) + vrow(10, OUT_F)
    out_ref[...] = jnp.tanh(out).astype(out_ref.dtype)


def init_params(key):
    """Deterministic params. Linear weights ~ U(-1/sqrt(in), 1/sqrt(in)) like PyTorch.
    Weights stored as (in, out); biases / gamma / beta as (1, out) rows."""
    params = []
    keys = jax.random.split(key, 16)
    ki = 0
    for li in range(5):
        fin, fout = DIMS[li], DIMS[li + 1]
        bound = 1.0 / math.sqrt(fin)
        w = jax.random.uniform(keys[ki], (fin, fout), jnp.float32, -bound, bound); ki += 1
        b = jax.random.uniform(keys[ki], (1, fout), jnp.float32, -bound, bound); ki += 1
        params.append(w)
        params.append(b)
        if li in (1, 2, 3):  # layers followed by BatchNorm1d
            params.append(jnp.ones((1, fout), jnp.float32))   # gamma
            params.append(jnp.zeros((1, fout), jnp.float32))  # beta
    return params


def pack_params(params):
    """Pack the 16 parameter arrays into ONE padded f32 slab. Called ONCE at
    init time (not per forward)."""
    (w1, b1,
     w2, b2, g2, be2,
     w3, b3, g3, be3,
     w4, b4, g4, be4,
     w5, b5) = params

    slab = jnp.zeros((SLAB_ROWS, OUT_F), jnp.float32)
    slab = slab.at[0:w1.shape[0], 0:w1.shape[1]].set(w1)
    slab = slab.at[0:w2.shape[0], H:H + w2.shape[1]].set(w2)
    slab = slab.at[H:H + w3.shape[0], 0:w3.shape[1]].set(w3)
    slab = slab.at[H:H + w4.shape[0], H:H + w4.shape[1]].set(w4)
    slab = slab.at[2 * H:2 * H + w5.shape[0], 0:w5.shape[1]].set(w5)

    vecs = [b1, b2, g2, be2, b3, g3, be3, b4, g4, be4, b5]
    for r, v in enumerate(vecs):
        slab = slab.at[V_ROW0 + r:V_ROW0 + r + 1, 0:v.shape[1]].set(v)
    return slab


@jax.jit
def generator_forward(z, slab):
    """Jitted forward: z (B, LATENT_DIM) + pre-packed slab -> (B, C, H, W)."""
    B = z.shape[0]
    # lane-dense latent: zero-pad to 128 lanes (padded lanes multiply zero rows)
    z_pad = jnp.zeros((B, H), jnp.float32).at[:, :LATENT_DIM].set(z)

    flops_per_example = 2 * sum(DIMS[i] * DIMS[i + 1] for i in range(5))
    cost = pl.CostEstimate(
        flops=B * flops_per_example,
        transcendentals=B * DIMS[-1] + 3 * H,  # tanh + rsqrt
        bytes_accessed=4 * (B * H + SLAB_ROWS * OUT_F + B * DIMS[-1]),
    )

    vmem_spec = pl.BlockSpec(memory_space=pltpu.MemorySpace.VMEM)
    out_flat = pl.pallas_call(
        generator_kernel,
        out_shape=jax.ShapeDtypeStruct((B, DIMS[-1]), jnp.float32),
        in_specs=[vmem_spec, vmem_spec],
        out_specs=vmem_spec,
        cost_estimate=cost,
    )(z_pad, slab)
    # PyTorch: img.view(B, *img_shape) -> NCHW
    return out_flat.reshape(B, *IMG_SHAPE)


def generator_forward_ref(z, params):
    """Pure-JAX reference with the original (two-pass, unfused) BN formulation."""
    (w1, b1,
     w2, b2, g2, be2,
     w3, b3, g3, be3,
     w4, b4, g4, be4,
     w5, b5) = params
    h = _leaky_relu(z @ w1 + b1)

    def bn_block(h, w, b, g, be):
        y = h @ w + b
        mean = jnp.mean(y, axis=0, keepdims=True)
        var = jnp.mean((y - mean) ** 2, axis=0, keepdims=True)
        y = (y - mean) * jax.lax.rsqrt(var + BN_EPS)
        return _leaky_relu(y * g + be)

    h = bn_block(h, w2, b2, g2, be2)
    h = bn_block(h, w3, b3, g3, be3)
    h = bn_block(h, w4, b4, g4, be4)
    out = jnp.tanh(h @ w5 + b5)
    return out.reshape(z.shape[0], *IMG_SHAPE)


if __name__ == "__main__":
    key = jax.random.PRNGKey(0)
    k_z, k_p = jax.random.split(key)

    B = 8  # multiple of 8 -> full sublanes; BN stats computed over the whole batch
    z = jax.random.normal(k_z, (B, LATENT_DIM), dtype=jnp.float32)
    params = init_params(k_p)
    slab = jax.block_until_ready(pack_params(params))  # packed ONCE at init

    img = generator_forward(z, slab)
    img = jax.block_until_ready(img)

    img_ref = generator_forward_ref(z, params)
    assert img.shape == (B, CHANNELS, IMG_SIZE, IMG_SIZE), img.shape
    assert jnp.allclose(img, img_ref, atol=2e-5, rtol=2e-5), "mismatch vs JAX reference"

    print("KERNEL_OK")
</pallas_src>

<mosaic_0001>
module attributes {stable_mosaic.version = 11 : i64} {
  func.func @generator_kernel(%arg0: memref<8x128xf32, #tpu.memory_space<vmem>>, %arg1: memref<400x256xf32, #tpu.memory_space<vmem>>, %arg2: memref<8x256xf32, #tpu.memory_space<vmem>>) attributes {dimension_semantics = [], scalar_prefetch = 0 : i64, scratch_operands = 0 : i64, tpu.core_type = #tpu.core_type<tc>} {
    %c0 = arith.constant 0 : index
    %c0_0 = arith.constant 0 : index
    %0 = vector.load %arg0[%c0, %c0_0] : memref<8x128xf32, #tpu.memory_space<vmem>>, vector<8x128xf32>
    %c0_1 = arith.constant 0 : index
    %c0_2 = arith.constant 0 : index
    %1 = vector.load %arg1[%c0_1, %c0_2] : memref<400x256xf32, #tpu.memory_space<vmem>>, vector<128x128xf32>
    %c0_3 = arith.constant 0 : index
    %c128 = arith.constant 128 : index
    %2 = vector.load %arg1[%c0_3, %c128] : memref<400x256xf32, #tpu.memory_space<vmem>>, vector<128x128xf32>
    %c128_4 = arith.constant 128 : index
    %c0_5 = arith.constant 0 : index
    %3 = vector.load %arg1[%c128_4, %c0_5] : memref<400x256xf32, #tpu.memory_space<vmem>>, vector<128x128xf32>
    %c128_6 = arith.constant 128 : index
    %c128_7 = arith.constant 128 : index
    %4 = vector.load %arg1[%c128_6, %c128_7] : memref<400x256xf32, #tpu.memory_space<vmem>>, vector<128x128xf32>
    %c256 = arith.constant 256 : index
    %c0_8 = arith.constant 0 : index
    %5 = vector.load %arg1[%c256, %c0_8] : memref<400x256xf32, #tpu.memory_space<vmem>>, vector<128x256xf32>
    %cst = arith.constant dense<0.000000e+00> : vector<8x128xf32>
    %6 = tpu.matmul %0, %1, %cst {dimension_numbers = #tpu.dot_dimension_numbers<[1], [0], [0], [1], [0, 0, 1, 1], [], []>} : vector<8x128xf32>, vector<128x128xf32>, vector<8x128xf32> -> vector<8x128xf32>
    %c384 = arith.constant 384 : index
    %c0_9 = arith.constant 0 : index
    %7 = vector.load %arg1[%c384, %c0_9] : memref<400x256xf32, #tpu.memory_space<vmem>>, vector<1x128xf32>
    %8 = vector.broadcast %7 : vector<1x128xf32> to vector<8x128xf32>
    %9 = arith.addf %6, %8 : vector<8x128xf32>
    %cst_10 = arith.constant 0.000000e+00 : f32
    %10 = vector.broadcast %cst_10 : f32 to vector<8x128xf32>
    %11 = arith.cmpf ogt, %9, %10 : vector<8x128xf32>
    %cst_11 = arith.constant 2.000000e-01 : f32
    %12 = vector.broadcast %cst_11 : f32 to vector<8x128xf32>
    %13 = arith.mulf %12, %9 : vector<8x128xf32>
    %14 = arith.select %11, %9, %13 : vector<8x128xi1>, vector<8x128xf32>
    %cst_12 = arith.constant dense<0.000000e+00> : vector<8x128xf32>
    %15 = tpu.matmul %14, %2, %cst_12 {dimension_numbers = #tpu.dot_dimension_numbers<[1], [0], [0], [1], [0, 0, 1, 1], [], []>} : vector<8x128xf32>, vector<128x128xf32>, vector<8x128xf32> -> vector<8x128xf32>
    %c385 = arith.constant 385 : index
    %c0_13 = arith.constant 0 : index
    %16 = vector.load %arg1[%c385, %c0_13] : memref<400x256xf32, #tpu.memory_space<vmem>>, vector<1x128xf32>
    %17 = vector.broadcast %16 : vector<1x128xf32> to vector<8x128xf32>
    %18 = arith.addf %15, %17 : vector<8x128xf32>
    %cst_14 = arith.constant dense<0.000000e+00> : vector<128xf32>
    %19 = vector.multi_reduction <add>, %18, %cst_14 [0] : vector<8x128xf32> to vector<128xf32>
    %20 = vector.shape_cast %19 : vector<128xf32> to vector<1x128xf32>
    %cst_15 = arith.constant 8.000000e+00 : f32
    %21 = vector.broadcast %cst_15 : f32 to vector<1x128xf32>
    %22 = arith.divf %20, %21 : vector<1x128xf32>
    %23 = arith.mulf %18, %18 : vector<8x128xf32>
    %cst_16 = arith.constant dense<0.000000e+00> : vector<128xf32>
    %24 = vector.multi_reduction <add>, %23, %cst_16 [0] : vector<8x128xf32> to vector<128xf32>
    %25 = vector.shape_cast %24 : vector<128xf32> to vector<1x128xf32>
    %cst_17 = arith.constant 8.000000e+00 : f32
    %26 = vector.broadcast %cst_17 : f32 to vector<1x128xf32>
    %27 = arith.divf %25, %26 : vector<1x128xf32>
    %28 = arith.mulf %22, %22 : vector<1x128xf32>
    %29 = arith.subf %27, %28 : vector<1x128xf32>
    %c386 = arith.constant 386 : index
    %c0_18 = arith.constant 0 : index
    %30 = vector.load %arg1[%c386, %c0_18] : memref<400x256xf32, #tpu.memory_space<vmem>>, vector<1x128xf32>
    %cst_19 = arith.constant 8.000000e-01 : f32
    %31 = vector.broadcast %cst_19 : f32 to vector<1x128xf32>
    %32 = arith.addf %29, %31 : vector<1x128xf32>
    %33 = math.rsqrt %32 : vector<1x128xf32>
    %34 = arith.mulf %30, %33 : vector<1x128xf32>
    %c387 = arith.constant 387 : index
    %c0_20 = arith.constant 0 : index
    %35 = vector.load %arg1[%c387, %c0_20] : memref<400x256xf32, #tpu.memory_space<vmem>>, vector<1x128xf32>
    %36 = arith.mulf %22, %34 : vector<1x128xf32>
    %37 = arith.subf %35, %36 : vector<1x128xf32>
    %38 = vector.broadcast %34 : vector<1x128xf32> to vector<8x128xf32>
    %39 = arith.mulf %18, %38 : vector<8x128xf32>
    %40 = vector.broadcast %37 : vector<1x128xf32> to vector<8x128xf32>
    %41 = arith.addf %39, %40 : vector<8x128xf32>
    %cst_21 = arith.constant 0.000000e+00 : f32
    %42 = vector.broadcast %cst_21 : f32 to vector<8x128xf32>
    %43 = arith.cmpf ogt, %41, %42 : vector<8x128xf32>
    %cst_22 = arith.constant 2.000000e-01 : f32
    %44 = vector.broadcast %cst_22 : f32 to vector<8x128xf32>
    %45 = arith.mulf %44, %41 : vector<8x128xf32>
    %46 = arith.select %43, %41, %45 : vector<8x128xi1>, vector<8x128xf32>
    %cst_23 = arith.constant dense<0.000000e+00> : vector<8x128xf32>
    %47 = tpu.matmul %46, %3, %cst_23 {dimension_numbers = #tpu.dot_dimension_numbers<[1], [0], [0], [1], [0, 0, 1, 1], [], []>} : vector<8x128xf32>, vector<128x128xf32>, vector<8x128xf32> -> vector<8x128xf32>
    %c388 = arith.constant 388 : index
    %c0_24 = arith.constant 0 : index
    %48 = vector.load %arg1[%c388, %c0_24] : memref<400x256xf32, #tpu.memory_space<vmem>>, vector<1x128xf32>
    %49 = vector.broadcast %48 : vector<1x128xf32> to vector<8x128xf32>
    %50 = arith.addf %47, %49 : vector<8x128xf32>
    %cst_25 = arith.constant dense<0.000000e+00> : vector<128xf32>
    %51 = vector.multi_reduction <add>, %50, %cst_25 [0] : vector<8x128xf32> to vector<128xf32>
    %52 = vector.shape_cast %51 : vector<128xf32> to vector<1x128xf32>
    %cst_26 = arith.constant 8.000000e+00 : f32
    %53 = vector.broadcast %cst_26 : f32 to vector<1x128xf32>
    %54 = arith.divf %52, %53 : vector<1x128xf32>
    %55 = arith.mulf %50, %50 : vector<8x128xf32>
    %cst_27 = arith.constant dense<0.000000e+00> : vector<128xf32>
    %56 = vector.multi_reduction <add>, %55, %cst_27 [0] : vector<8x128xf32> to vector<128xf32>
    %57 = vector.shape_cast %56 : vector<128xf32> to vector<1x128xf32>
    %cst_28 = arith.constant 8.000000e+00 : f32
    %58 = vector.broadcast %cst_28 : f32 to vector<1x128xf32>
    %59 = arith.divf %57, %58 : vector<1x128xf32>
    %60 = arith.mulf %54, %54 : vector<1x128xf32>
    %61 = arith.subf %59, %60 : vector<1x128xf32>
    %c389 = arith.constant 389 : index
    %c0_29 = arith.constant 0 : index
    %62 = vector.load %arg1[%c389, %c0_29] : memref<400x256xf32, #tpu.memory_space<vmem>>, vector<1x128xf32>
    %cst_30 = arith.constant 8.000000e-01 : f32
    %63 = vector.broadcast %cst_30 : f32 to vector<1x128xf32>
    %64 = arith.addf %61, %63 : vector<1x128xf32>
    %65 = math.rsqrt %64 : vector<1x128xf32>
    %66 = arith.mulf %62, %65 : vector<1x128xf32>
    %c390 = arith.constant 390 : index
    %c0_31 = arith.constant 0 : index
    %67 = vector.load %arg1[%c390, %c0_31] : memref<400x256xf32, #tpu.memory_space<vmem>>, vector<1x128xf32>
    %68 = arith.mulf %54, %66 : vector<1x128xf32>
    %69 = arith.subf %67, %68 : vector<1x128xf32>
    %70 = vector.broadcast %66 : vector<1x128xf32> to vector<8x128xf32>
    %71 = arith.mulf %50, %70 : vector<8x128xf32>
    %72 = vector.broadcast %69 : vector<1x128xf32> to vector<8x128xf32>
    %73 = arith.addf %71, %72 : vector<8x128xf32>
    %cst_32 = arith.constant 0.000000e+00 : f32
    %74 = vector.broadcast %cst_32 : f32 to vector<8x128xf32>
    %75 = arith.cmpf ogt, %73, %74 : vector<8x128xf32>
    %cst_33 = arith.constant 2.000000e-01 : f32
    %76 = vector.broadcast %cst_33 : f32 to vector<8x128xf32>
    %77 = arith.mulf %76, %73 : vector<8x128xf32>
    %78 = arith.select %75, %73, %77 : vector<8x128xi1>, vector<8x128xf32>
    %cst_34 = arith.constant dense<0.000000e+00> : vector<8x128xf32>
    %79 = tpu.matmul %78, %4, %cst_34 {dimension_numbers = #tpu.dot_dimension_numbers<[1], [0], [0], [1], [0, 0, 1, 1], [], []>} : vector<8x128xf32>, vector<128x128xf32>, vector<8x128xf32> -> vector<8x128xf32>
    %c391 = arith.constant 391 : index
    %c0_35 = arith.constant 0 : index
    %80 = vector.load %arg1[%c391, %c0_35] : memref<400x256xf32, #tpu.memory_space<vmem>>, vector<1x128xf32>
    %81 = vector.broadcast %80 : vector<1x128xf32> to vector<8x128xf32>
    %82 = arith.addf %79, %81 : vector<8x128xf32>
    %cst_36 = arith.constant dense<0.000000e+00> : vector<128xf32>
    %83 = vector.multi_reduction <add>, %82, %cst_36 [0] : vector<8x128xf32> to vector<128xf32>
    %84 = vector.shape_cast %83 : vector<128xf32> to vector<1x128xf32>
    %cst_37 = arith.constant 8.000000e+00 : f32
    %85 = vector.broadcast %cst_37 : f32 to vector<1x128xf32>
    %86 = arith.divf %84, %85 : vector<1x128xf32>
    %87 = arith.mulf %82, %82 : vector<8x128xf32>
    %cst_38 = arith.constant dense<0.000000e+00> : vector<128xf32>
    %88 = vector.multi_reduction <add>, %87, %cst_38 [0] : vector<8x128xf32> to vector<128xf32>
    %89 = vector.shape_cast %88 : vector<128xf32> to vector<1x128xf32>
    %cst_39 = arith.constant 8.000000e+00 : f32
    %90 = vector.broadcast %cst_39 : f32 to vector<1x128xf32>
    %91 = arith.divf %89, %90 : vector<1x128xf32>
    %92 = arith.mulf %86, %86 : vector<1x128xf32>
    %93 = arith.subf %91, %92 : vector<1x128xf32>
    %c392 = arith.constant 392 : index
    %c0_40 = arith.constant 0 : index
    %94 = vector.load %arg1[%c392, %c0_40] : memref<400x256xf32, #tpu.memory_space<vmem>>, vector<1x128xf32>
    %cst_41 = arith.constant 8.000000e-01 : f32
    %95 = vector.broadcast %cst_41 : f32 to vector<1x128xf32>
    %96 = arith.addf %93, %95 : vector<1x128xf32>
    %97 = math.rsqrt %96 : vector<1x128xf32>
    %98 = arith.mulf %94, %97 : vector<1x128xf32>
    %c393 = arith.constant 393 : index
    %c0_42 = arith.constant 0 : index
    %99 = vector.load %arg1[%c393, %c0_42] : memref<400x256xf32, #tpu.memory_space<vmem>>, vector<1x128xf32>
    %100 = arith.mulf %86, %98 : vector<1x128xf32>
    %101 = arith.subf %99, %100 : vector<1x128xf32>
    %102 = vector.broadcast %98 : vector<1x128xf32> to vector<8x128xf32>
    %103 = arith.mulf %82, %102 : vector<8x128xf32>
    %104 = vector.broadcast %101 : vector<1x128xf32> to vector<8x128xf32>
    %105 = arith.addf %103, %104 : vector<8x128xf32>
    %cst_43 = arith.constant 0.000000e+00 : f32
    %106 = vector.broadcast %cst_43 : f32 to vector<8x128xf32>
    %107 = arith.cmpf ogt, %105, %106 : vector<8x128xf32>
    %cst_44 = arith.constant 2.000000e-01 : f32
    %108 = vector.broadcast %cst_44 : f32 to vector<8x128xf32>
    %109 = arith.mulf %108, %105 : vector<8x128xf32>
    %110 = arith.select %107, %105, %109 : vector<8x128xi1>, vector<8x128xf32>
    %cst_45 = arith.constant dense<0.000000e+00> : vector<8x256xf32>
    %111 = tpu.matmul %110, %5, %cst_45 {dimension_numbers = #tpu.dot_dimension_numbers<[1], [0], [0], [1], [0, 0, 1, 1], [], []>} : vector<8x128xf32>, vector<128x256xf32>, vector<8x256xf32> -> vector<8x256xf32>
    %c394 = arith.constant 394 : index
    %c0_46 = arith.constant 0 : index
    %112 = vector.load %arg1[%c394, %c0_46] : memref<400x256xf32, #tpu.memory_space<vmem>>, vector<1x256xf32>
    %113 = vector.broadcast %112 : vector<1x256xf32> to vector<8x256xf32>
    %114 = arith.addf %111, %113 : vector<8x256xf32>
    %115 = math.tanh %114 : vector<8x256xf32>
    %c0_47 = arith.constant 0 : index
    %c0_48 = arith.constant 0 : index
    %116 = vector.load %arg2[%c0_47, %c0_48] : memref<8x256xf32, #tpu.memory_space<vmem>>, vector<8x256xf32>
    tpu.vector_store %arg2[%c0_47, %c0_48], %115 {strides = array<i32>} : memref<8x256xf32, #tpu.memory_space<vmem>>, vector<8x256xf32>,
    return
  }
}

</mosaic_0001>

<bundles_post_ra>
// kernel: generator_forward.1
= control target key start
LH: loop header
LB: loop body
LE: loop exit
PB: predicated region body
PF: predicated region fallthrough
CT: control target
= control target key end

     0   :  { %7 = vsyncpa [#allocation3], 0  ;;  %s966_s9 = smov [#allocation2]   ;;  %s1049_s0 = inlined_call_operand.vmem [shape: f32[8,128], index: 0, kind: input, shape index: {}]   ;;  %s1050_s1 = inlined_call_operand.hbm [shape: f32[400,256], index: 1, kind: input, shape index: {}]   ;;  %s1051_s2 = inlined_call_operand.vmem [shape: f32[8,256], index: 2, kind: output, shape index: {}]  }
   0x1   :  { %s15_s10 = sshll.u32 %s966_s9, 4  ;;  %s942_s13 = scalar_lea.hbm %s1050_s1, 12800  ;;  %s16_s10 = int_to_ptr.vmem [resolvable:$true] %s15_s10 }
   0x2   :  { %p943_p0 = scmp.ne.s32.totalorder %s1050_s1, %s942_s13  ;;  %p946_p1 = scmp.lt.u32.totalorder %s942_s13, %s1050_s1 }
   0x4   :  { %p948_p2 = pnand %p946_p1, %p943_p0 }
   0x6   :  { %951 = shalt.err (!%p948_p2)
}
   0x7   :  { %s952_s18 = scalar_lea.vmem %s16_s10, 12800  ;;  %p957_p4 = scmp.lt.s32.totalorder %s16_s10, %s16_s10 }
   0x8   :  { %p953_p3 = scmp.ne.s32.totalorder %s16_s10, %s952_s18  ;;  %p958_p5 = scmp.lt.s32.totalorder %s952_s18, %s952_s18 }
   0xa   :  { %p959_p6 = por %p958_p5, %p957_p4 }
   0xc   :  { %p960_p7 = pnand %p959_p6, %p953_p3 }
   0xe   :  { %963 = shalt.err (!%p960_p7)
}
   0xf   :  { %s967_s19 = smov 256   ;;  %s968_s20 = smov 16  }
  0x10   :  { %21 = dma.hbm_to_vmem [thread:$0]  %s1050_s1, 12800, %s16_s10, [#allocation3], %s967_s19, %s967_s19, %s968_s20  }
  0x11   :  { %964 = dma.done.wait [#allocation3], 12800  }
  0x12   :  { %965 = vsyncadd [#allocation3], 4294954496  ;;  %v969_v0 = vmov 0.0|0.0   ;;  %vm970_vm0 = vmmov 0   ;;  %v971_v1 = vmov 0.0   ;;  %v26_v2 = vld [vmem:[#allocation2] sm:$0xff] }
  0x13   :  { %798 = vmatprep.subr.bf16.mxu0 %v969_v0  ;;  %690 = vmatprep.mubr.msk.f32.mxu0 %vm970_vm0, %v971_v1  ;;  %v27_v3 = vld [vmem:[#allocation2 + $0x10] sm:$0xff]  ;;  %v28_v4 = vld [vmem:[#allocation2 + $0x20] sm:$0xff]  ;;  %v42_v10 = vld [vmem:[#allocation2 + $0x8] sm:$0xff] }
  0x14   :  { %822 = vmatprep.subr.bf16.mxu1 %v969_v0  ;;  %725 = vmatprep.mubr.msk.f32.mxu1 %vm970_vm0, %v971_v1  ;;  %v799_v5 = vpack.c.bf16 %v27_v3, %v26_v2  ;;  %v29_v6 = vld [vmem:[#allocation2 + $0x30] sm:$0xff]  ;;  %v30_v8 = vld [vmem:[#allocation2 + $0x40] sm:$0xff]  ;;  %v43_v11 = vld [vmem:[#allocation2 + $0x18] sm:$0xff] }
  0x15   :  { %v802_v7 = vpack.c.bf16 %v29_v6, %v28_v4  ;;  %v31_v9 = vld [vmem:[#allocation2 + $0x50] sm:$0xff]  ;;  %v44_v12 = vld [vmem:[#allocation2 + $0x28] sm:$0xff]  ;;  %v45_v13 = vld [vmem:[#allocation2 + $0x38] sm:$0xff]  ;;  %v823_v15 = vpack.c.bf16 %v43_v11, %v42_v10 }
  0x16   :  { %800 = vmatpush3.bf16.msra.mxu0 %v799_v5  ;;  %v805_v14 = vpack.c.bf16 %v31_v9, %v30_v8  ;;  %v32_v16 = vld [vmem:[#allocation2 + $0x60] sm:$0xff]  ;;  %v33_v17 = vld [vmem:[#allocation2 + $0x70] sm:$0xff]  ;;  %v826_v18 = vpack.c.bf16 %v45_v13, %v44_v12  ;;  %v46_v19 = vld [vmem:[#allocation2 + $0x48] sm:$0xff] }
  0x17   :  { %801 = vmatprep.subr.bf16.mxu0 %v969_v0  ;;  %824 = vmatpush3.bf16.msra.mxu1 %v823_v15  ;;  %v47_v20 = vld [vmem:[#allocation2 + $0x58] sm:$0xff]  ;;  %v808_v21 = vpack.c.bf16 %v33_v17, %v32_v16  ;;  %v34_v22 = vld [vmem:[#allocation2 + $0x80] sm:$0xff]  ;;  %v35_v23 = vld [vmem:[#allocation2 + $0x90] sm:$0xff] }
  0x18   :  { %825 = vmatprep.subr.bf16.mxu1 %v969_v0  ;;  %v829_v24 = vpack.c.bf16 %v47_v20, %v46_v19  ;;  %v48_v25 = vld [vmem:[#allocation2 + $0x68] sm:$0xff]  ;;  %v49_v26 = vld [vmem:[#allocation2 + $0x78] sm:$0xff]  ;;  %v811_v27 = vpack.c.bf16 %v35_v23, %v34_v22  ;;  %v36_v28 = vld [vmem:[#allocation2 + $0xa0] sm:$0xff] }
  0x19   :  { %v37_v29 = vld [vmem:[#allocation2 + $0xb0] sm:$0xff]  ;;  %v832_v30 = vpack.c.bf16 %v49_v26, %v48_v25  ;;  %v50_v31 = vld [vmem:[#allocation2 + $0x88] sm:$0xff]  ;;  %v51_v32 = vld [vmem:[#allocation2 + $0x98] sm:$0xff] }
  0x1a   :  { %803 = vmatpush3.bf16.msra.mxu0 %v802_v7  ;;  %v814_v33 = vpack.c.bf16 %v37_v29, %v36_v28  ;;  %v38_v34 = vld [vmem:[#allocation2 + $0xc0] sm:$0xff]  ;;  %v39_v35 = vld [vmem:[#allocation2 + $0xd0] sm:$0xff]  ;;  %v835_v36 = vpack.c.bf16 %v51_v32, %v50_v31  ;;  %v52_v37 = vld [vmem:[#allocation2 + $0xa8] sm:$0xff] }
  0x1b   :  { %804 = vmatprep.subr.bf16.mxu0 %v969_v0  ;;  %827 = vmatpush3.bf16.msra.mxu1 %v826_v18  ;;  %v53_v38 = vld [vmem:[#allocation2 + $0xb8] sm:$0xff]  ;;  %v817_v39 = vpack.c.bf16 %v39_v35, %v38_v34  ;;  %v40_v40 = vld [vmem:[#allocation2 + $0xe0] sm:$0xff]  ;;  %v41_v41 = vld [vmem:[#allocation2 + $0xf0] sm:$0xff] }
  0x1c   :  { %828 = vmatprep.subr.bf16.mxu1 %v969_v0  ;;  %v838_v42 = vpack.c.bf16 %v53_v38, %v52_v37  ;;  %v54_v43 = vld [vmem:[#allocation2 + $0xc8] sm:$0xff]  ;;  %v55_v44 = vld [vmem:[#allocation2 + $0xd8] sm:$0xff]  ;;  %v820_v45 = vpack.c.bf16 %v41_v41, %v40_v40  ;;  %v25_v47 = vld [vmem:[%s1049_s0] sm:$0xff] }
  0x1d   :  { %v841_v46 = vpack.c.bf16 %v55_v44, %v54_v43  ;;  %v56_v48 = vld [vmem:[#allocation2 + $0xe8] sm:$0xff]  ;;  %v57_v49 = vld [vmem:[#allocation2 + $0xf8] sm:$0xff]  ;;  %v122_v51 = vld [vmem:[#allocation2 + $0x300] ss:$0 sm:$0xff] }
  0x1e   :  { %806 = vmatpush3.bf16.msra.mxu0 %v805_v14  ;;  %v844_v50 = vpack.c.bf16 %v57_v49, %v56_v48  ;;  %v58_v57 = vld [vmem:[#allocation2 + $0x100] sm:$0xff]  ;;  %v59_v58 = vld [vmem:[#allocation2 + $0x110] sm:$0xff] }
  0x1f   :  { %807 = vmatprep.subr.bf16.mxu0 %v969_v0  ;;  %830 = vmatpush3.bf16.msra.mxu1 %v829_v24  ;;  %v847_v59 = vpack.c.bf16 %v59_v58, %v58_v57  ;;  %v60_v60 = vld [vmem:[#allocation2 + $0x120] sm:$0xff]  ;;  %v61_v61 = vld [vmem:[#allocation2 + $0x130] sm:$0xff]  ;;  %v78_v57 = vld [vmem:[#allocation2 + $0x148] sm:$0xff] }
  0x20   :  { %831 = vmatprep.subr.bf16.mxu1 %v969_v0  ;;  %v850_v62 = vpack.c.bf16 %v61_v61, %v60_v60  ;;  %v62_v63 = vld [vmem:[#allocation2 + $0x140] sm:$0xff]  ;;  %v63_v2 = vld [vmem:[#allocation2 + $0x150] sm:$0xff]  ;;  %v79_v58 = vld [vmem:[#allocation2 + $0x158] sm:$0xff] }
  0x21   :  { %v853_v3 = vpack.c.bf16 %v63_v2, %v62_v63  ;;  %v64_v4 = vld [vmem:[#allocation2 + $0x160] sm:$0xff]  ;;  %v65_v5 = vld [vmem:[#allocation2 + $0x170] sm:$0xff]  ;;  %v80_v60 = vld [vmem:[#allocation2 + $0x168] sm:$0xff] }
  0x22   :  { %809 = vmatpush3.bf16.msra.mxu0 %v808_v21  ;;  %v856_v6 = vpack.c.bf16 %v65_v5, %v64_v4  ;;  %v66_v7 = vld [vmem:[#allocation2 + $0x180] sm:$0xff]  ;;  %v67_v8 = vld [vmem:[#allocation2 + $0x190] sm:$0xff]  ;;  %v83_v63 = vld [vmem:[#allocation2 + $0x198] sm:$0xff] }
  0x23   :  { %810 = vmatprep.subr.bf16.mxu0 %v969_v0  ;;  %833 = vmatpush3.bf16.msra.mxu1 %v832_v30  ;;  %v859_v9 = vpack.c.bf16 %v67_v8, %v66_v7  ;;  %v68_v10 = vld [vmem:[#allocation2 + $0x1a0] sm:$0xff]  ;;  %v69_v11 = vld [vmem:[#allocation2 + $0x1b0] sm:$0xff]  ;;  %v85_v4 = vld [vmem:[#allocation2 + $0x1b8] sm:$0xff] }
  0x24   :  { %834 = vmatprep.subr.bf16.mxu1 %v969_v0  ;;  %v862_v12 = vpack.c.bf16 %v69_v11, %v68_v10  ;;  %v70_v13 = vld [vmem:[#allocation2 + $0x1c0] sm:$0xff]  ;;  %v71_v14 = vld [vmem:[#allocation2 + $0x1d0] sm:$0xff]  ;;  %v87_v7 = vld [vmem:[#allocation2 + $0x1d8] sm:$0xff] }
  0x25   :  { %v865_v15 = vpack.c.bf16 %v71_v14, %v70_v13  ;;  %v72_v16 = vld [vmem:[#allocation2 + $0x1e0] sm:$0xff]  ;;  %v73_v17 = vld [vmem:[#allocation2 + $0x1f0] sm:$0xff]  ;;  %v89_v10 = vld [vmem:[#allocation2 + $0x1f8] sm:$0xff] }
  0x26   :  { %812 = vmatpush3.bf16.msra.mxu0 %v811_v27  ;;  %v868_v18 = vpack.c.bf16 %v73_v17, %v72_v16  ;;  %v196_v19 = vld [vmem:[#allocation2 + $0x301] ss:$0 sm:$0xff]  ;;  %v285_v41 = vld [vmem:[#allocation2 + $0x302] ss:$0 sm:$0xff]  ;;  %v289_v44 = vld [vmem:[#allocation2 + $0x303] ss:$0 sm:$0xff] }
  0x27   :  { %813 = vmatprep.subr.bf16.mxu0 %v969_v0  ;;  %836 = vmatpush3.bf16.msra.mxu1 %v835_v36 }
  0x28   :  { %837 = vmatprep.subr.bf16.mxu1 %v969_v0 }
  0x2a   :  { %815 = vmatpush3.bf16.msra.mxu0 %v814_v33 }
  0x2b   :  { %816 = vmatprep.subr.bf16.mxu0 %v969_v0  ;;  %839 = vmatpush3.bf16.msra.mxu1 %v838_v42 }
  0x2c   :  { %840 = vmatprep.subr.bf16.mxu1 %v969_v0 }
  0x2e   :  { %818 = vmatpush3.bf16.msra.mxu0 %v817_v39 }
  0x2f   :  { %819 = vmatprep.subr.bf16.mxu0 %v969_v0  ;;  %842 = vmatpush3.bf16.msra.mxu1 %v841_v46 }
  0x30   :  { %843 = vmatprep.subr.bf16.mxu1 %v969_v0 }
  0x32   :  { %821 = vmatpush3.bf16.msra.mxu0 %v820_v45 }
  0x33   :  { %846 = vmatprep.subr.bf16.mxu0 %v969_v0  ;;  %845 = vmatpush3.bf16.msra.mxu1 %v844_v50 }
  0x34   :  { %870 = vmatprep.subr.bf16.mxu1 %v969_v0 }
  0x35   :  { %691 = vmatmul.mubr.f32.vlgmr.msra.gmra.mrb[0].mxu0 %v25_v47 }
  0x36   :  { %760 = vmatprep.mubr.msk.f32.mxu0 %vm970_vm0, %v971_v1  ;;  %848 = vmatpush3.bf16.msra.mxu0 %v847_v59  ;;  %v877_v59 = vpack.c.bf16 %v79_v58, %v78_v57  ;;  %v98_v58 = vld [vmem:[#allocation2 + $0x240] sm:$0xff] }
  0x37   :  { %849 = vmatprep.subr.bf16.mxu0 %v969_v0 }
  0x3a   :  { %851 = vmatpush3.bf16.msra.mxu0 %v850_v62  ;;  %v82_v62 = vld [vmem:[#allocation2 + $0x188] sm:$0xff] }
  0x3b   :  { %852 = vmatprep.subr.bf16.mxu0 %v969_v0  ;;  %v883_v2 = vpack.c.bf16 %v83_v63, %v82_v62  ;;  %v102_v63 = vld [vmem:[#allocation2 + $0x260] sm:$0xff] }
  0x3e   :  { %854 = vmatpush3.bf16.msra.mxu0 %v853_v3  ;;  %v84_v3 = vld [vmem:[#allocation2 + $0x1a8] sm:$0xff] }
  0x3f   :  { %855 = vmatprep.subr.bf16.mxu0 %v969_v0  ;;  %v886_v5 = vpack.c.bf16 %v85_v4, %v84_v3  ;;  %v107_v4 = vld [vmem:[#allocation2 + $0x288] sm:$0xff] }
  0x42   :  { %857 = vmatpush3.bf16.msra.mxu0 %v856_v6  ;;  %v86_v6 = vld [vmem:[#allocation2 + $0x1c8] sm:$0xff] }
  0x43   :  { %858 = vmatprep.subr.bf16.mxu0 %v969_v0  ;;  %v889_v8 = vpack.c.bf16 %v87_v7, %v86_v6  ;;  %v106_v7 = vld [vmem:[#allocation2 + $0x280] sm:$0xff] }
  0x46   :  { %860 = vmatpush3.bf16.msra.mxu0 %v859_v9  ;;  %v88_v9 = vld [vmem:[#allocation2 + $0x1e8] sm:$0xff] }
  0x47   :  { %861 = vmatprep.subr.bf16.mxu0 %v969_v0  ;;  %v892_v11 = vpack.c.bf16 %v89_v10, %v88_v9  ;;  %v111_v10 = vld [vmem:[#allocation2 + $0x2a8] sm:$0xff] }
  0x4a   :  { %863 = vmatpush3.bf16.msra.mxu0 %v862_v12  ;;  %v297_v12 = vld [vmem:[#allocation2 + $0x304] ss:$0 sm:$0xff] }
  0x4b   :  { %864 = vmatprep.subr.bf16.mxu0 %v969_v0 }
  0x4e   :  { %866 = vmatpush3.bf16.msra.mxu0 %v865_v15 }
  0x4f   :  { %867 = vmatprep.subr.bf16.mxu0 %v969_v0 }
  0x52   :  { %869 = vmatpush3.bf16.msra.mxu0 %v868_v18 }
 0x108   :  { %v189_v52 = vpop.f32.mrb[0].mxu0 }
 0x109   :  { %v190_v53 = vadd.f32 %v189_v52, %v122_v51  ;;  %v692_v54 = vpop.f32.mrb[1].mxu0  ;;  %v74_v51 = vld [vmem:[#allocation2 + $0x108] sm:$0xff]  ;;  %v75_v52 = vld [vmem:[#allocation2 + $0x118] sm:$0xff] }
 0x10a   :  { %v76_v54 = vld [vmem:[#allocation2 + $0x128] sm:$0xff] }
 0x10b   :  { %v194_v55 = vmul.f32 0.2, %v190_v53  ;;  %vm193_vm1 = vcmp.gt.f32.partialorder %v190_v53, 0.0 }
 0x10d   :  { %v195_v56 = vsel %vm193_vm1, %v190_v53, %v194_v55  ;;  %v871_v53 = vpack.c.bf16 %v75_v52, %v74_v51  ;;  %v77_v55 = vld [vmem:[#allocation2 + $0x138] sm:$0xff]  ;;  %v94_v52 = vld [vmem:[#allocation2 + $0x220] sm:$0xff] }
 0x10e   :  { %726 = vmatmul.mubr.f32.vlgmr.msra.gmra.mrb[0].mxu1 %v195_v56  ;;  %v874_v56 = vpack.c.bf16 %v77_v55, %v76_v54  ;;  %v99_v55 = vld [vmem:[#allocation2 + $0x248] sm:$0xff] }
 0x10f   :  { %795 = vmatprep.mubr.msk.f32.mxu1 %vm970_vm0, %v971_v1  ;;  %872 = vmatpush3.bf16.msra.mxu1 %v871_v53  ;;  %v96_v53 = vld [vmem:[#allocation2 + $0x230] sm:$0xff] }
 0x110   :  { %873 = vmatprep.subr.bf16.mxu1 %v969_v0  ;;  %v900_v54 = vpack.c.bf16 %v96_v53, %v94_v52  ;;  %v489_v52 = vld [vmem:[#allocation2 + $0x311] ss:$0 sm:$0xff] }
 0x113   :  { %875 = vmatpush3.bf16.msra.mxu1 %v874_v56  ;;  %v101_v56 = vld [vmem:[#allocation2 + $0x258] sm:$0xff] }
 0x114   :  { %876 = vmatprep.subr.bf16.mxu1 %v969_v0  ;;  %v902_v57 = vpack.c.bf16 %v101_v56, %v99_v55 }
 0x117   :  { %878 = vmatpush3.bf16.msra.mxu1 %v877_v59  ;;  %v100_v59 = vld [vmem:[#allocation2 + $0x250] sm:$0xff] }
 0x118   :  { %879 = vmatprep.subr.bf16.mxu1 %v969_v0 }
 0x1e1   :  { %v263_v20 = vpop.f32.mrb[0].mxu1 }
 0x1e2   :  { %v264_v21 = vadd.f32 %v263_v20, %v196_v19  ;;  %v727_v22 = vpop.f32.mrb[1].mxu1 }
 0x1e4   :  { %v267_v23 = vrot.slane %v264_v21, 4  ;;  %v275_v24 = vmul.f32 %v264_v21, %v264_v21 }
 0x1e6   :  { %v268_v25 = vadd.f32 %v267_v23, %v264_v21  ;;  %v276_v26 = vrot.slane %v275_v24, 4 }
 0x1e8   :  { %v269_v27 = vrot.slane %v268_v25, 2  ;;  %v277_v28 = vadd.f32 %v276_v26, %v275_v24 }
 0x1ea   :  { %v270_v29 = vadd.f32 %v269_v27, %v268_v25  ;;  %v278_v30 = vrot.slane %v277_v28, 2 }
 0x1ec   :  { %v271_v31 = vrot.slane %v270_v29, 1  ;;  %v279_v32 = vadd.f32 %v278_v30, %v277_v28 }
 0x1ee   :  { %v272_v33 = vadd.f32 %v271_v31, %v270_v29  ;;  %v280_v34 = vrot.slane %v279_v32, 1 }
 0x1f0   :  { %v274_v35 = vmul.f32 0.125, %v272_v33  ;;  %v281_v36 = vadd.f32 %v280_v34, %v279_v32  ;;  %v385_v33 = vld [vmem:[#allocation2 + $0x305] ss:$0 sm:$0xff] }
 0x1f2   :  { %v282_v37 = vmul.f32 0.125, %v281_v36  ;;  %v283_v38 = vmul.f32 %v274_v35, %v274_v35  ;;  %v389_v36 = vld [vmem:[#allocation2 + $0x306] ss:$0 sm:$0xff] }
 0x1f4   :  { %v284_v39 = vsub.f32 %v282_v37, %v283_v38 }
 0x1f6   :  { %v286_v40 = vadd.f32 0.8, %v284_v39 }
 0x1f8   :  { %932 = vrsqrt.f32 %v286_v40 }
 0x202   :  { %v933_v42 = vpop.eup %932 }
 0x203   :  { %v288_v43 = vmul.f32 %v933_v42, %v285_v41 }
 0x205   :  { %v290_v45 = vmul.f32 %v288_v43, %v274_v35  ;;  %v292_v46 = vmul.f32 %v288_v43, %v264_v21  ;;  %v91_v43 = vld [vmem:[#allocation2 + $0x208] sm:$0xff] }
 0x207   :  { %v291_v47 = vsub.f32 %v289_v44, %v290_v45  ;;  %v93_v44 = vld [vmem:[#allocation2 + $0x218] sm:$0xff] }
 0x208   :  { %v894_v45 = vpack.c.bf16 %v93_v44, %v91_v43 }
 0x209   :  { %v293_v48 = vadd.f32 %v292_v46, %v291_v47  ;;  %v90_v46 = vld [vmem:[#allocation2 + $0x200] sm:$0xff]  ;;  %v92_v47 = vld [vmem:[#allocation2 + $0x210] sm:$0xff] }
 0x20a   :  { %895 = vmatprep.subr.bf16.mxu0 %v894_v45 }
 0x20b   :  { %vm294_vm2 = vcmp.gt.f32.partialorder %v293_v48, 0.0  ;;  %v295_v49 = vmul.f32 0.2, %v293_v48 }
 0x20d   :  { %v296_v50 = vsel %vm294_vm2, %v293_v48, %v295_v49  ;;  %v896_v48 = vpack.c.bf16 %v92_v47, %v90_v46  ;;  %v95_v49 = vld [vmem:[#allocation2 + $0x228] sm:$0xff] }
 0x20e   :  { %761 = vmatmul.mubr.f32.vlgmr.msra.gmra.mrb[2].mxu0 %v296_v50  ;;  %v97_v50 = vld [vmem:[#allocation2 + $0x238] sm:$0xff] }
 0x20f   :  { %574 = vmatprep.mubr.f32.mxu0 %v971_v1  ;;  %v81_v1 = vld [vmem:[#allocation2 + $0x178] sm:$0xff]  ;;  %897 = vmatpush1.bf16.msra.mxu0 %v896_v48  ;;  %v898_v51 = vpack.c.bf16 %v97_v50, %v95_v49  ;;  %v485_v49 = vld [vmem:[#allocation2 + $0x310] ss:$0 sm:$0xff] }
 0x210   :  { %v880_v61 = vpack.c.bf16 %v81_v1, %v80_v60  ;;  %v904_v60 = vpack.c.bf16 %v100_v59, %v98_v58  ;;  %v103_v1 = vld [vmem:[#allocation2 + $0x268] sm:$0xff]  ;;  %v500_v59 = vlaneseq }
 0x211   :  { %899 = vmatprep.subr.bf16.mxu0 %v898_v51 }
 0x212   :  { %881 = vmatpush3.bf16.msra.mxu1 %v880_v61  ;;  %v105_v61 = vld [vmem:[#allocation2 + $0x278] sm:$0xff] }
 0x213   :  { %882 = vmatprep.subr.bf16.mxu1 %v969_v0  ;;  %901 = vmatpush1.bf16.msra.mxu0 %v900_v54  ;;  %v906_v62 = vpack.c.bf16 %v105_v61, %v103_v1  ;;  %v498_v61 = vld [vmem:[#allocation2 + $0x312] ss:$8 sm:$0x3] }
 0x214   :  { %903 = vmatprep.subr.bf16.mxu0 %v902_v57 }
 0x216   :  { %884 = vmatpush3.bf16.msra.mxu1 %v883_v2  ;;  %v104_v2 = vld [vmem:[#allocation2 + $0x270] sm:$0xff] }
 0x217   :  { %885 = vmatprep.subr.bf16.mxu1 %v969_v0  ;;  %905 = vmatpush1.bf16.msra.mxu0 %v904_v60  ;;  %v908_v3 = vpack.c.bf16 %v104_v2, %v102_v63  ;;  %v501_v60 = vshrl.u32 %v500_v59, 7 }
 0x218   :  { %907 = vmatprep.subr.bf16.mxu0 %v906_v62 }
 0x219   :  { %v502_v1 = vsub.s32 0, %v501_v60  ;;  %v506_v62 = vsub.s32 1, %v501_v60 }
 0x21a   :  { %887 = vmatpush3.bf16.msra.mxu1 %v886_v5  ;;  %v109_v5 = vld [vmem:[#allocation2 + $0x298] sm:$0xff] }
 0x21b   :  { %888 = vmatprep.subr.bf16.mxu1 %v969_v0  ;;  %909 = vmatpush1.bf16.msra.mxu0 %v908_v3  ;;  %v910_v6 = vpack.c.bf16 %v109_v5, %v107_v4  ;;  %v503_v63 = vrot.slane %v498_v61, %v502_v1  ;;  %v507_v2 = vrot.slane %v498_v61, %v506_v62 }
 0x21d   :  { %911 = vmatprep.subr.bf16.mxu0 %v910_v6 }
 0x21e   :  { %890 = vmatpush3.bf16.msra.mxu1 %v889_v8  ;;  %v108_v8 = vld [vmem:[#allocation2 + $0x290] sm:$0xff] }
 0x21f   :  { %891 = vmatprep.subr.bf16.mxu1 %v969_v0  ;;  %v912_v9 = vpack.c.bf16 %v108_v8, %v106_v7 }
 0x221   :  { %913 = vmatpush1.bf16.msra.mxu0 %v912_v9 }
 0x222   :  { %893 = vmatpush3.bf16.msra.mxu1 %v892_v11  ;;  %v113_v11 = vld [vmem:[#allocation2 + $0x2b8] sm:$0xff] }
 0x2e1   :  { %v364_v13 = vpop.f32.mrb[2].mxu0 }
 0x2e2   :  { %v365_v14 = vadd.f32 %v364_v13, %v297_v12  ;;  %v762_v15 = vpop.f32.mrb[3].mxu0  ;;  %v914_v12 = vpack.c.bf16 %v113_v11, %v111_v10  ;;  %v110_v13 = vld [vmem:[#allocation2 + $0x2a0] sm:$0xff] }
 0x2e4   :  { %v368_v16 = vrot.slane %v365_v14, 4  ;;  %v375_v17 = vmul.f32 %v365_v14, %v365_v14  ;;  %915 = vmatprep.subr.bf16.mxu0 %v914_v12 }
 0x2e6   :  { %v369_v18 = vadd.f32 %v368_v16, %v365_v14  ;;  %v376_v19 = vrot.slane %v375_v17, 4  ;;  %v115_v16 = vld [vmem:[#allocation2 + $0x2c8] sm:$0xff] }
 0x2e8   :  { %v370_v20 = vrot.slane %v369_v18, 2  ;;  %v377_v21 = vadd.f32 %v376_v19, %v375_v17  ;;  %v117_v17 = vld [vmem:[#allocation2 + $0x2d8] sm:$0xff]  ;;  %v114_v19 = vld [vmem:[#allocation2 + $0x2c0] sm:$0xff] }
 0x2ea   :  { %v371_v22 = vadd.f32 %v370_v20, %v369_v18  ;;  %v378_v23 = vrot.slane %v377_v21, 2  ;;  %v918_v18 = vpack.c.bf16 %v117_v17, %v115_v16  ;;  %v116_v20 = vld [vmem:[#allocation2 + $0x2d0] sm:$0xff] }
 0x2ec   :  { %v372_v24 = vrot.slane %v371_v22, 1  ;;  %v379_v25 = vadd.f32 %v378_v23, %v377_v21  ;;  %v920_v21 = vpack.c.bf16 %v116_v20, %v114_v19  ;;  %v121_v23 = vld [vmem:[#allocation2 + $0x2f8] sm:$0xff] }
 0x2ee   :  { %v373_v26 = vadd.f32 %v372_v24, %v371_v22  ;;  %v380_v27 = vrot.slane %v379_v25, 1  ;;  %v119_v22 = vld [vmem:[#allocation2 + $0x2e8] sm:$0xff]  ;;  %v118_v24 = vld [vmem:[#allocation2 + $0x2e0] sm:$0xff] }
 0x2f0   :  { %v374_v28 = vmul.f32 0.125, %v373_v26  ;;  %v381_v29 = vadd.f32 %v380_v27, %v379_v25  ;;  %v922_v25 = vpack.c.bf16 %v121_v23, %v119_v22  ;;  %v120_v26 = vld [vmem:[#allocation2 + $0x2f0] sm:$0xff] }
 0x2f1   :  { %v924_v27 = vpack.c.bf16 %v120_v26, %v118_v24 }
 0x2f2   :  { %v382_v0 = vmul.f32 0.125, %v381_v29  ;;  %v383_v30 = vmul.f32 %v374_v28, %v374_v28 }
 0x2f4   :  { %v384_v31 = vsub.f32 %v382_v0, %v383_v30 }
 0x2f6   :  { %v386_v32 = vadd.f32 0.8, %v384_v31 }
 0x2f8   :  { %934 = vrsqrt.f32 %v386_v32 }
 0x302   :  { %v935_v34 = vpop.eup %934 }
 0x303   :  { %v388_v35 = vmul.f32 %v935_v34, %v385_v33 }
 0x305   :  { %v390_v37 = vmul.f32 %v388_v35, %v374_v28  ;;  %v392_v38 = vmul.f32 %v388_v35, %v365_v14  ;;  %v112_v14 = vld [vmem:[#allocation2 + $0x2b0] sm:$0xff]  ;;  %v397_v28 = vld [vmem:[#allocation2 + $0x307] ss:$0 sm:$0xff] }
 0x306   :  { %v916_v15 = vpack.c.bf16 %v112_v14, %v110_v13 }
 0x307   :  { %v391_v39 = vsub.f32 %v389_v36, %v390_v37 }
 0x308   :  { %917 = vmatpush1.bf16.msra.mxu0 %v916_v15 }
 0x309   :  { %v393_v40 = vadd.f32 %v392_v38, %v391_v39  ;;  %919 = vmatprep.subr.bf16.mxu0 %v918_v18 }
 0x30b   :  { %vm394_vm3 = vcmp.gt.f32.partialorder %v393_v40, 0.0  ;;  %v395_v41 = vmul.f32 0.2, %v393_v40 }
 0x30c   :  { %921 = vmatpush1.bf16.msra.mxu0 %v920_v21 }
 0x30d   :  { %v396_v42 = vsel %vm394_vm3, %v393_v40, %v395_v41  ;;  %923 = vmatprep.subr.bf16.mxu0 %v922_v25 }
 0x30e   :  { %796 = vmatmul.mubr.f32.vlgmr.msra.gmra.mrb[2].mxu1 %v396_v42 }
 0x310   :  { %925 = vmatpush1.bf16.msra.mxu0 %v924_v27 }
 0x3e1   :  { %v464_v29 = vpop.f32.mrb[2].mxu1 }
 0x3e2   :  { %v465_v0 = vadd.f32 %v464_v29, %v397_v28  ;;  %v797_v30 = vpop.f32.mrb[3].mxu1 }
 0x3e4   :  { %v468_v31 = vrot.slane %v465_v0, 4  ;;  %v475_v32 = vmul.f32 %v465_v0, %v465_v0 }
 0x3e6   :  { %v469_v33 = vadd.f32 %v468_v31, %v465_v0  ;;  %v476_v34 = vrot.slane %v475_v32, 4 }
 0x3e8   :  { %v470_v35 = vrot.slane %v469_v33, 2  ;;  %v477_v36 = vadd.f32 %v476_v34, %v475_v32 }
 0x3ea   :  { %v471_v37 = vadd.f32 %v470_v35, %v469_v33  ;;  %v478_v38 = vrot.slane %v477_v36, 2 }
 0x3ec   :  { %v472_v39 = vrot.slane %v471_v37, 1  ;;  %v479_v40 = vadd.f32 %v478_v38, %v477_v36 }
 0x3ee   :  { %v473_v41 = vadd.f32 %v472_v39, %v471_v37  ;;  %v480_v42 = vrot.slane %v479_v40, 1 }
 0x3f0   :  { %v474_v43 = vmul.f32 0.125, %v473_v41  ;;  %v481_v44 = vadd.f32 %v480_v42, %v479_v40 }
 0x3f2   :  { %v482_v45 = vmul.f32 0.125, %v481_v44  ;;  %v483_v46 = vmul.f32 %v474_v43, %v474_v43 }
 0x3f4   :  { %v484_v47 = vsub.f32 %v482_v45, %v483_v46 }
 0x3f6   :  { %v486_v48 = vadd.f32 0.8, %v484_v47 }
 0x3f8   :  { %936 = vrsqrt.f32 %v486_v48 }
 0x402   :  { %v937_v50 = vpop.eup %936 }
 0x403   :  { %v488_v51 = vmul.f32 %v937_v50, %v485_v49 }
 0x405   :  { %v490_v53 = vmul.f32 %v488_v51, %v474_v43  ;;  %v492_v54 = vmul.f32 %v488_v51, %v465_v0 }
 0x407   :  { %v491_v55 = vsub.f32 %v489_v52, %v490_v53 }
 0x409   :  { %v493_v56 = vadd.f32 %v492_v54, %v491_v55 }
 0x40b   :  { %vm494_vm4 = vcmp.gt.f32.partialorder %v493_v56, 0.0  ;;  %v495_v57 = vmul.f32 0.2, %v493_v56 }
 0x40d   :  { %v496_v58 = vsel %vm494_vm4, %v493_v56, %v495_v57 }
 0x40e   :  { %575 = vmatmul.mubr.f32.vlgmr.msra.gmra.mrb[4].mxu0 %v496_v58 }
 0x4e1   :  { %v576_v3 = vpop.f32.mrb[4].mxu0 }
 0x4e2   :  { %v577_v4 = vadd.f32 %v576_v3, %v503_v63  ;;  %v578_v5 = vpop.f32.mrb[5].mxu0 }
 0x4e3   :  { %v579_v6 = vadd.f32 %v578_v5, %v507_v2 }
 0x4e4   :  { %938 = vtanh.f32 %v577_v4 }
 0x4e5   :  { %940 = vtanh.f32 %v579_v6 }
 0x4ee   :  { %v939_v7 = vpop.eup %938 }
 0x4ef   :  { %v941_v8 = vpop.eup %940  ;;  %583 = vst [vmem:[%s1051_s2] sm:$0xff] %v939_v7 }
 0x4f0   :  { %584 = vst [vmem:[%s1051_s2 + $0x8] sm:$0xff] %v941_v8 }
 0x4f1   :  { %589 = vsyncpa [#allocation3], 1 }

</bundles_post_ra>
